<compile_context>
chip_gen: v6e
topology: v6e:2x2x1
jax: 0.10.0
libtpu: 0.0.40
codegen_flags: <defaults>
</compile_context>

<pallas_src>
import functools

import jax
import jax.numpy as jnp
from jax import lax
from jax.experimental import pallas as pl
from jax.experimental.pallas import tpu as pltpu


def _conv3x3_kernel(x_ref, w_ref, o_ref, col_ref, *, TH, Wp, K3):
    # x_ref:   (1, TH+2, Wp, 3*Cin)  kw-packed row-halo slab (streamed per step)
    # w_ref:   (Cout, 9*Cin)         weight, K columns ordered (kh, kw, cin)
    # o_ref:   (1, Cout, TH*Wp)      lane-dense flat-NCHW output tile
    # col_ref: (TH*Wp, 9*Cin)        VMEM im2col scratch
    N = TH * Wp
    # Build im2col with 3 lane-dense stores (one per kh); kw is already packed in channels.
    for kh in range(3):
        sl = x_ref[0, kh:kh + TH, :, :]                      # (TH, Wp, 3*Cin), static slice
        col_ref[:, kh * K3:(kh + 1) * K3] = sl.reshape(N, K3)

    # One MXU contraction with K = 9*Cin, f32 accumulation, output already (Cout, N).
    res = lax.dot_general(
        w_ref[...], col_ref[...],
        dimension_numbers=(((1,), (1,)), ((), ())),
        preferred_element_type=jnp.float32)                  # (Cout, N)
    o_ref[0] = res.astype(o_ref.dtype)


def _choose_row_tile(Hp, Wp, cin, cout, in_isz, out_isz, batch,
                     budget_bytes=10 << 20, max_n=2048):
    """Largest divisor TH of Hp such that N = TH*Wp is lane-dense (multiple of 128, or the
    full image) with N <= max_n and the per-step VMEM working set under budget."""
    def footprint(th):
        n = th * Wp
        return (2 * (th + 2) * Wp * 3 * cin * in_isz   # double-buffered input slabs
                + n * 9 * cin * in_isz                  # im2col scratch
                + n * cout * 4                          # f32 matmul result
                + 2 * n * cout * out_isz                # double-buffered output tiles
                + cout * 9 * cin * in_isz)              # resident weight

    cands = [th for th in range(1, Hp + 1)
             if Hp % th == 0 and ((th * Wp) % 128 == 0 or th == Hp)]
    ok = [th for th in cands if th * Wp <= max_n and footprint(th) <= budget_bytes]
    if ok:
        if batch == 1:                 # keep >= 2 grid units for v7x megacore if possible
            sub = [th for th in ok if th < Hp]
            if sub:
                return max(sub)
        return max(ok)
    return min(cands)                  # nothing under budget: smallest legal tile


def downsample_conv2d(x_nchw, weight_oihw, stride=2, compute_dtype=jnp.bfloat16):
    """DownsampleConv2d.forward (kernel_size=3, no bias, sparse=False).

    x_nchw:      (B, Cin, H, W)
    weight_oihw: (Cout, Cin*stride^2, 3, 3)   (PyTorch conv weight layout)
    returns:     (B, Cout, H//stride, W//stride)
    """
    B, C, H, W = x_nchw.shape
    s = stride
    assert H % s == 0 and W % s == 0, "spatial dims must be divisible by stride"
    Hp, Wp = H // s, W // s
    Cin = C * s * s
    Cout = weight_oihw.shape[0]
    assert weight_oihw.shape == (Cout, Cin, 3, 3), weight_oihw.shape
    out_dtype = x_nchw.dtype
    if compute_dtype is None:
        compute_dtype = out_dtype

    # --- glue: space-to-depth + NCHW->NHWC, pad=1, kw-pack into channels ---
    # channel ordering matches InvertibleDownsample: ch = (a*s + d)*C + c
    x = x_nchw.reshape(B, C, Hp, s, Wp, s)
    x = jnp.transpose(x, (0, 2, 4, 3, 5, 1)).reshape(B, Hp, Wp, Cin)
    x = x.astype(compute_dtype)
    x = jnp.pad(x, ((0, 0), (1, 1), (1, 1), (0, 0)))          # (B, Hp+2, Wp+2, Cin)
    # packed channel = kw*Cin + c
    x = jnp.concatenate([x[:, :, kw:kw + Wp, :] for kw in range(3)],
                        axis=-1)                              # (B, Hp+2, Wp, 3*Cin)

    # weight (Cout, Cin, 3, 3) -> (Cout, 9*Cin), columns ordered (kh, kw, cin)
    wmat = jnp.transpose(weight_oihw, (0, 2, 3, 1)).reshape(Cout, 9 * Cin)
    wmat = wmat.astype(compute_dtype)

    in_isz = jnp.dtype(compute_dtype).itemsize
    out_isz = jnp.dtype(out_dtype).itemsize
    TH = _choose_row_tile(Hp, Wp, Cin, Cout, in_isz, out_isz, B)
    n_rt = Hp // TH
    N = TH * Wp
    K3 = 3 * Cin

    # Overlapping (TH+2)-row halo slabs, flattened to (B*n_rt, TH+2, Wp, 3*Cin) so a plain
    # BlockSpec streams exactly one slab per grid step (auto double-buffered).
    x_tiles = jnp.stack([x[:, rt * TH:rt * TH + TH + 2] for rt in range(n_rt)],
                        axis=1).reshape(B * n_rt, TH + 2, Wp, K3)

    kernel = functools.partial(_conv3x3_kernel, TH=TH, Wp=Wp, K3=K3)

    flops = 2 * B * Hp * Wp * 9 * Cin * Cout
    bytes_accessed = (x_tiles.size * in_isz + wmat.size * in_isz
                      + B * Cout * Hp * Wp * out_isz)

    out_flat = pl.pallas_call(
        kernel,
        out_shape=jax.ShapeDtypeStruct((B, Cout, Hp * Wp), out_dtype),
        grid_spec=pltpu.PrefetchScalarGridSpec(
            num_scalar_prefetch=0,
            grid=(B, n_rt),
            in_specs=[
                # one small row-halo slab per step (VMEM = O(tile), not O(image))
                pl.BlockSpec((1, TH + 2, Wp, K3),
                             lambda b, rt: (b * n_rt + rt, 0, 0, 0)),
                # weight matrix: resident across the whole grid
                pl.BlockSpec((Cout, 9 * Cin), lambda b, rt: (0, 0)),
            ],
            out_specs=pl.BlockSpec((1, Cout, N), lambda b, rt: (b, 0, rt)),
            scratch_shapes=[pltpu.VMEM((N, 9 * Cin), compute_dtype)],
        ),
        compiler_params=pltpu.CompilerParams(
            dimension_semantics=("parallel", "parallel")),
        cost_estimate=pl.CostEstimate(flops=flops, transcendentals=0,
                                      bytes_accessed=bytes_accessed),
    )(x_tiles, wmat)

    # free metadata reshape: (B, Cout, Hp*Wp) -> (B, Cout, Hp, Wp)
    return out_flat.reshape(B, Cout, Hp, Wp)


def _reference(x_nchw, weight_oihw, stride=2):
    b, c, h, w = x_nchw.shape
    s = stride
    ds = x_nchw.reshape(b, c, h // s, s, w // s, s)
    ds = jnp.transpose(ds, (0, 3, 5, 1, 2, 4)).reshape(b, c * s * s, h // s, w // s)
    return lax.conv_general_dilated(
        ds, weight_oihw, window_strides=(1, 1), padding=((1, 1), (1, 1)),
        dimension_numbers=("NCHW", "OIHW", "NCHW"))


if __name__ == "__main__":
    key = jax.random.PRNGKey(0)
    k1, k2, k3, k4 = jax.random.split(key, 4)

    # Test 1: small module-consistent shapes (B=2, Cin=4, H=W=16, stride=2, Cout=8).
    B, Cin, H, W, stride, Cout = 2, 4, 16, 16, 2, 8
    x = jax.random.normal(k1, (B, Cin, H, W), dtype=jnp.float32)
    wgt = jax.random.normal(k2, (Cout, Cin * stride ** 2, 3, 3), dtype=jnp.float32) * 0.1
    ref = jax.block_until_ready(_reference(x, wgt, stride=stride))

    # exact f32-compute path: tight tolerance
    out_f32 = jax.block_until_ready(
        downsample_conv2d(x, wgt, stride=stride, compute_dtype=jnp.float32))
    assert out_f32.shape == (B, Cout, H // stride, W // stride), out_f32.shape
    assert jnp.allclose(out_f32, ref, atol=1e-3, rtol=1e-3), \
        float(jnp.max(jnp.abs(out_f32 - ref)))

    # default bf16-compute path (f32 accumulation): looser tolerance
    out_bf = jax.block_until_ready(downsample_conv2d(x, wgt, stride=stride))
    assert jnp.allclose(out_bf, ref, atol=5e-2, rtol=5e-2), \
        float(jnp.max(jnp.abs(out_bf - ref)))

    # Test 2: larger shapes exercising the large lane-dense row tile (N = 1024).
    B2, Cin2, H2, W2, Cout2 = 2, 8, 64, 64, 32
    x2 = jax.random.normal(k3, (B2, Cin2, H2, W2), dtype=jnp.float32)
    wgt2 = jax.random.normal(k4, (Cout2, Cin2 * stride ** 2, 3, 3), dtype=jnp.float32) * 0.1
    ref2 = jax.block_until_ready(_reference(x2, wgt2, stride=stride))
    out2 = jax.block_until_ready(downsample_conv2d(x2, wgt2, stride=stride))
    assert out2.shape == (B2, Cout2, H2 // stride, W2 // stride), out2.shape
    assert jnp.allclose(out2, ref2, atol=5e-2, rtol=5e-2), \
        float(jnp.max(jnp.abs(out2 - ref2)))

    print("KERNEL_OK")
</pallas_src>

<mosaic_0001>
module attributes {stable_mosaic.version = 11 : i64} {
  func.func @_conv3x3_kernel(%arg0: i32, %arg1: i32, %arg2: memref<1x10x8x48xf32, #tpu.memory_space<vmem>>, %arg3: memref<8x144xf32, #tpu.memory_space<vmem>>, %arg4: memref<1x8x64xf32, #tpu.memory_space<vmem>>, %arg5: memref<64x144xf32, #tpu.memory_space<vmem>>) attributes {dimension_semantics = [#tpu.dimension_semantics<parallel>, #tpu.dimension_semantics<parallel>], iteration_bounds = array<i64: 2, 1>, scalar_prefetch = 0 : i64, scratch_operands = 1 : i64, tpu.core_type = #tpu.core_type<tc>, window_params = [{transform_indices = @transform_0, window_bounds = array<i64: 1, 10, 8, 48>}, {pipeline_mode = #tpu.pipeline_mode<synchronous>, transform_indices = @transform_1, window_bounds = array<i64: 8, 144>}, {transform_indices = @transform_2, window_bounds = array<i64: 1, 8, 64>}]} {
    %c0 = arith.constant 0 : index
    %c0_0 = arith.constant 0 : index
    %c0_1 = arith.constant 0 : index
    %c0_2 = arith.constant 0 : index
    %0 = vector.load %arg2[%c0, %c0_0, %c0_1, %c0_2] : memref<1x10x8x48xf32, #tpu.memory_space<vmem>>, vector<1x8x8x48xf32>
    %1 = vector.shape_cast %0 : vector<1x8x8x48xf32> to vector<8x8x48xf32>
    %2 = vector.shape_cast %1 : vector<8x8x48xf32> to vector<64x48xf32>
    %c0_3 = arith.constant 0 : index
    %c0_4 = arith.constant 0 : index
    %3 = vector.load %arg5[%c0_3, %c0_4] : memref<64x144xf32, #tpu.memory_space<vmem>>, vector<64x48xf32>
    tpu.vector_store %arg5[%c0_3, %c0_4], %2 {strides = array<i32>} : memref<64x144xf32, #tpu.memory_space<vmem>>, vector<64x48xf32>,
    %c0_5 = arith.constant 0 : index
    %c1 = arith.constant 1 : index
    %c0_6 = arith.constant 0 : index
    %c0_7 = arith.constant 0 : index
    %4 = vector.load %arg2[%c0_5, %c1, %c0_6, %c0_7] : memref<1x10x8x48xf32, #tpu.memory_space<vmem>>, vector<1x8x8x48xf32>
    %5 = vector.shape_cast %4 : vector<1x8x8x48xf32> to vector<8x8x48xf32>
    %6 = vector.shape_cast %5 : vector<8x8x48xf32> to vector<64x48xf32>
    %c0_8 = arith.constant 0 : index
    %c48 = arith.constant 48 : index
    %7 = vector.load %arg5[%c0_8, %c48] : memref<64x144xf32, #tpu.memory_space<vmem>>, vector<64x48xf32>
    tpu.vector_store %arg5[%c0_8, %c48], %6 {strides = array<i32>} : memref<64x144xf32, #tpu.memory_space<vmem>>, vector<64x48xf32>,
    %c0_9 = arith.constant 0 : index
    %c2 = arith.constant 2 : index
    %c0_10 = arith.constant 0 : index
    %c0_11 = arith.constant 0 : index
    %8 = vector.load %arg2[%c0_9, %c2, %c0_10, %c0_11] : memref<1x10x8x48xf32, #tpu.memory_space<vmem>>, vector<1x8x8x48xf32>
    %9 = vector.shape_cast %8 : vector<1x8x8x48xf32> to vector<8x8x48xf32>
    %10 = vector.shape_cast %9 : vector<8x8x48xf32> to vector<64x48xf32>
    %c0_12 = arith.constant 0 : index
    %c96 = arith.constant 96 : index
    %11 = vector.load %arg5[%c0_12, %c96] : memref<64x144xf32, #tpu.memory_space<vmem>>, vector<64x48xf32>
    tpu.vector_store %arg5[%c0_12, %c96], %10 {strides = array<i32>} : memref<64x144xf32, #tpu.memory_space<vmem>>, vector<64x48xf32>,
    %c0_13 = arith.constant 0 : index
    %c0_14 = arith.constant 0 : index
    %12 = vector.load %arg3[%c0_13, %c0_14] : memref<8x144xf32, #tpu.memory_space<vmem>>, vector<8x144xf32>
    %c0_15 = arith.constant 0 : index
    %c0_16 = arith.constant 0 : index
    %13 = vector.load %arg5[%c0_15, %c0_16] : memref<64x144xf32, #tpu.memory_space<vmem>>, vector<64x144xf32>
    %cst = arith.constant dense<0.000000e+00> : vector<8x64xf32>
    %14 = tpu.matmul %12, %13, %cst {dimension_numbers = #tpu.dot_dimension_numbers<[1], [1], [0], [0], [0, 0, 1, 0], [], []>} : vector<8x144xf32>, vector<64x144xf32>, vector<8x64xf32> -> vector<8x64xf32>
    %c0_17 = arith.constant 0 : index
    %c0_18 = arith.constant 0 : index
    %c0_19 = arith.constant 0 : index
    %15 = vector.load %arg4[%c0_17, %c0_18, %c0_19] : memref<1x8x64xf32, #tpu.memory_space<vmem>>, vector<1x8x64xf32>
    %16 = vector.shape_cast %15 : vector<1x8x64xf32> to vector<8x64xf32>
    %17 = vector.shape_cast %14 : vector<8x64xf32> to vector<1x8x64xf32>
    tpu.vector_store %arg4[%c0_17, %c0_18, %c0_19], %17 {strides = array<i32>} : memref<1x8x64xf32, #tpu.memory_space<vmem>>, vector<1x8x64xf32>,
    return
  }
  func.func @transform_0(%arg0: i32, %arg1: i32) -> (i32, i32, i32, i32) {
    %c1_i32 = arith.constant 1 : i32
    %0 = arith.muli %arg0, %c1_i32 : i32
    %1 = arith.addi %0, %arg1 : i32
    %c0_i32 = arith.constant 0 : i32
    %c0_i32_0 = arith.constant 0 : i32
    %c0_i32_1 = arith.constant 0 : i32
    %c0_i32_2 = arith.constant 0 : i32
    return %1, %c0_i32, %c0_i32_0, %c0_i32_1 : i32, i32, i32, i32
  }
  func.func @transform_1(%arg0: i32, %arg1: i32) -> (i32, i32) {
    %c0_i32 = arith.constant 0 : i32
    %c0_i32_0 = arith.constant 0 : i32
    %c0_i32_1 = arith.constant 0 : i32
    return %c0_i32, %c0_i32_0 : i32, i32
  }
  func.func @transform_2(%arg0: i32, %arg1: i32) -> (i32, i32, i32) {
    %c0_i32 = arith.constant 0 : i32
    %c0_i32_0 = arith.constant 0 : i32
    return %arg0, %c0_i32, %arg1 : i32, i32, i32
  }
}

</mosaic_0001>

<bundles_post_ra>
// kernel: tpu_custom_call.1
= control target key start
LH: loop header
LB: loop body
LE: loop exit
PB: predicated region body
PF: predicated region fallthrough
CT: control target
= control target key end

     0   :  { %7 = vsyncpa [#allocation4], 0  ;;  %s1058_s0 = inlined_call_operand.hbm [shape: f32[2,10,8,48], index: 0, kind: input, shape index: {}]   ;;  %s1059_s1 = inlined_call_operand.hbm [shape: f32[8,144], index: 1, kind: input, shape index: {}]   ;;  %s1060_s2 = inlined_call_operand.hbm [shape: f32[2,8,64], index: 2, kind: output, shape index: {}]  }
   0x1   :  { %9 = vsyncpa [#allocation4 + $0x1], 0 }
   0x2   :  { %10 = vsyncpa [#allocation7], 0 }
   0x3   :  { %11 = vsyncpa [#allocation5], 0 }
   0x4   :  { %13 = vsyncpa [#allocation5 + $0x1], 0  ;;  %s821_s9 = smov 0   ;;  %s823_s10 = smov 0  }
   0x5   :  { %s825_s11 = smov 0   ;;  %s827_s12 = smov 0  }
   0x6   :  { %s829_s13 = smov 0   ;;  %s831_s14 = smov 0  }
   0x7 LB: > { %s541_s15 = sadd.s32 4294967295, %s797_s14   ;;  %s542_s16 = sadd.s32 4294967294, %s797_s14   ;;  %s797_s14 = sphi %s831_s14, %s19_s14   ;;  %s793_s13 = sphi %s829_s13, %s1079_s13   ;;  %s789_s12 = sphi %s827_s12, %s1078_s12   ;;  %s785_s11 = sphi %s825_s11, %s1077_s11   ;;  %s781_s10 = sphi %s823_s10, %s1076_s10   ;;  %s777_s9 = sphi %s821_s9, %s1075_s9  }
   0x8   : > { %s40_s17 = sadd.s32 1, %s785_s11  ;;  %p47_p0 = scmp.ne.s32.totalorder %s785_s11, %s781_s10 }
   0x9   : > { %p48_p1 = scmp.eq.s32.totalorder %s797_s14, 0  ;;  %p53_p2 = scmp.ne.s32.totalorder %s781_s10, %s777_s9 }
   0xa   : > { %p859_p3 = scmp.eq.s32.totalorder %s541_s15, 0  ;;  %p100_p4 = scmp.eq.s32.totalorder %s541_s15, 1 }
   0xb   : > { %p863_p5 = por %p48_p1, %p47_p0  ;;  %p106_p6 = scmp.eq.s32.totalorder %s542_s16, 1 }
   0xc   : > { %p869_p7 = por %p859_p3, %p53_p2  ;;  %p873_p8 = por %p100_p4, %p47_p0 }
   0xd   : > { %p877_p9 = por %p106_p6, %p53_p2  ;;  %p543_p10 = scmp.ge.s32.totalorder %s797_s14, 1 }
   0xe   : > { %s1065_s20 = scalar_select %p869_p7, 1, 0 }
   0xf   : > { %s1066_s21 = scalar_select %p873_p8, 1, 0 }
  0x10   : > { %s1067_s22 = scalar_select %p877_p9, 1, 0 }
  0x11   : > { %p113_p11 = scmp.lt.s32.totalorder %s797_s14, 3  ;;  %s799_s24 = smov [#allocation6]  }
  0x12   : > { %s126_s25 = sshll.u32 %s799_s24, 4  ;;  %p603_p1 = scmp.lt.s32.totalorder %s797_s14, 2  ;;  %s127_s25 = int_to_ptr.vmem [resolvable:$true] %s126_s25 }
  0x13   : > { %p884_p13 = pnand %p543_p10, %p113_p11  ;;  %s31_s28 = sadd.s32 1, %s793_s13 }
  0x14   : > { %p893_p4 = pnand %p603_p1, %p863_p5  ;;  %p33_p6 = scmp.ge.s32.totalorder %s31_s28, 2 }
  0x15   : > { %p590_p0 = pneg %p884_p13  ;;  %s137_s29 = sand.u32 1, %s785_s11  }
  0x16   : > { %s670_s30 = scalar_lea.vmem %s127_s25, 256  ;;  %p678_p8 = scmp.lt.s32.totalorder %s127_s25, %s127_s25 }
  0x17   : > { %p899_p2 = pnand %p590_p0, %p859_p3  ;;  %p671_p11 = scmp.ne.s32.totalorder %s127_s25, %s670_s30 }
  0x18   : > { %p679_p5 = scmp.lt.s32.totalorder %s670_s30, %s670_s30 }
  0x19   : > { %p661_p10 = pneg %p899_p2 }
  0x1a   : > { %p680_p1 = por %p679_p5, %p678_p8 }
  0x1b   : > { %p673_p12 = pnand %p671_p11, %p661_p10 }
  0x1d   : > { %p674_p9 = pneg %p673_p12 }
  0x1f   : > { %p681_p7 = pnand %p680_p1, %p674_p9 }
  0x21   : > { %684 = shalt.err (!%p681_p7)
}
  0x22   : > { %593 = dma.hbm_to_vmem [thread:$0]  (!%p899_p2), %s1059_s1, 256, %s127_s25, [#allocation7]  }
  0x23   : > { %s1081_s28 = smov (%p33_p6, %s31_s28), 0  ;;  %s579_s5 = smul.u32 80, %s137_s29 }
  0x24   : > { %s37_s6 = ssub.s32 %s793_s13, %s1081_s28  ;;  %s580_s7 = smul.u32 1280, %s793_s13 }
  0x25   : > { %p38_p8 = scmp.eq.s32.totalorder %s37_s6, 0  ;;  %s141_s19 = scalar_lea.vmem [#allocation3], %s579_s5 }
  0x26   : > { %s148_s16 = scalar_lea.hbm %s1058_s0, %s580_s7  ;;  %s149_s24 = sshll.u32 %s141_s19, 4  ;;  %s150_s24 = int_to_ptr.vmem [resolvable:$true] %s149_s24 }
  0x27   : > { %s923_s27 = scalar_select %p38_p8, %s785_s11, %s40_s17  }
  0x28   : > { %s138_s30 = scalar_lea.sflag [#allocation4], %s137_s29  ;;  %p687_p7 = pneg %p893_p4 }
  0x29   : > { %s698_s25 = scalar_lea.vmem %s150_s24, 1280  ;;  %s800_s3 = smov [#allocation3]  }
  0x2a   : > { %p699_p9 = scmp.ne.s32.totalorder %s150_s24, %s698_s25  ;;  %s703_s4 = sshll.u32 %s800_s3, 4  ;;  %s704_s4 = int_to_ptr.vmem [resolvable:$false] %s703_s4 }
  0x2b   : > { %s705_s6 = scalar_lea.vmem %s704_s4, 2560  ;;  %p706_p2 = scmp.lt.s32.totalorder %s150_s24, %s704_s4 }
  0x2c   : > { %p701_p12 = pnand %p699_p9, %p687_p7  ;;  %p707_p6 = scmp.lt.s32.totalorder %s705_s6, %s698_s25 }
  0x2e   : > { %p702_p0 = pneg %p701_p12  ;;  %p708_p10 = por %p707_p6, %p706_p2 }
  0x30   : > { %p709_p11 = pnand %p708_p10, %p702_p0 }
  0x32   : > { %712 = shalt.err (!%p709_p11)
}
  0x33   : > { %s801_s5 = smov 128   ;;  %s802_s17 = smov 8  }
  0x34   : > { %597 = dma.hbm_to_vmem [thread:$0]  (!%p893_p4), %s148_s16, 1280, %s150_s24, %s138_s30, %s801_s5, %s801_s5, %s802_s17  }
  0x35   : > { %161 = sbr.rel (%p884_p13) target bundleno = 429 (0x1ad), region = 28  ;;  %s932_s29 = sand.u32 (!%p884_p13), 1, %s781_s10  }
  0x36   : > { %s581_s7 = smul.u32 (!%p884_p13), 80, %s932_s29  ;;  %s164_s8 = scalar_lea.sflag (!%p884_p13), [#allocation4], %s932_s29 }
  0x37   : > { %p1071_p5 = scmp.ne.s32.totalorder (!%p884_p13), %s1065_s20, 0 }
  0x38   : > { %s936_s15 = scalar_lea.vmem (!%p884_p13), [#allocation3], %s581_s7 }
  0x3a   : > { %764 = dma.done.wait (%p1071_p5), %s164_s8, 1280  }
  0x3b   : > { %766 = vsyncadd (%p1071_p5), %s164_s8, 4294966016 }
  0x3c   : > { %768 = dma.done.wait (%p859_p3), [#allocation7], 256  }
  0x3d   : > { %770 = vsyncadd (%p859_p3), [#allocation7], 4294967040  ;;  %vm201_vm0 = vcmask 392192   ;;  %v557_v0 = vld [vmem:[%s936_s15 + $0x40] sm:$0xff]  ;;  %v565_v1 = vld [vmem:[%s936_s15 + $0x48] sm:$0xff]  ;;  %s803_s20 = smov 48  }
  0x3e   : > { %v556_v2 = vld [vmem:[%s936_s15 + $0x38] sm:$0xff]  ;;  %241 = vrot.lane.b32.xlu0 %v557_v0, %s803_s20  ;;  %v555_v3 = vld [vmem:[%s936_s15 + $0x30] sm:$0xff]  ;;  %v554_v4 = vld [vmem:[%s936_s15 + $0x28] sm:$0xff]  ;;  %s804_s18 = smov 96   ;;  %vm303_vm1 = vcmask 130048   ;;  %vm251_vm2 = vcmask 785792  }
  0x3f   : > { %239 = vrot.lane.b32.xlu1 %v556_v2, %s803_s20  ;;  %209 = vst.msk [vmem:[#allocation2 + $0x70] sm:$0xff] %vm201_vm0, %v556_v2  ;;  %v553_v5 = vld [vmem:[%s936_s15 + $0x20] sm:$0xff]  ;;  %v552_v6 = vld [vmem:[%s936_s15 + $0x18] sm:$0xff]  ;;  %v551_v7 = vld [vmem:[%s936_s15 + $0x10] sm:$0xff]  ;;  %vm301_vm3 = vcmask 1048320   ;;  %s549_s23 = sshll.u32 %s932_s29, 3 }
  0x40   : > { %208 = vst.msk [vmem:[#allocation2 + $0x60] sm:$0xff] %vm201_vm0, %v555_v3  ;;  %207 = vst.msk [vmem:[#allocation2 + $0x50] sm:$0xff] %vm201_vm0, %v554_v4  ;;  %v550_v8 = vld [vmem:[%s936_s15 + $0x8] sm:$0xff]  ;;  %v193_v9 = vld [vmem:[%s936_s15] sm:$0xff]  ;;  %s576_s26 = sshll.u32 %s789_s12, 7  ;;  %s191_s16 = scalar_lea.vmem [#allocation8], %s549_s23 }
  0x41   : > { %206 = vst.msk [vmem:[#allocation2 + $0x40] sm:$0xff] %vm201_vm0, %v553_v5  ;;  %205 = vst.msk [vmem:[#allocation2 + $0x30] sm:$0xff] %vm201_vm0, %v552_v6  ;;  %v320_v10 = vld [vmem:[#allocation6 + $0x8] sm:$0xff]  ;;  %v319_v43 = vld [vmem:[#allocation6] sm:$0xff]  ;;  %s451_s19 = sshll.u32 %s191_s16, 4  ;;  %vm434_vm4 = vcmask 523264   ;;  %s1010_s25 = scalar_lea.hbm %s1060_s2, %s576_s26  ;;  %s1012_s19 = int_to_ptr.vmem [resolvable:$true] %s451_s19 }
  0x42   : > { %204 = vst.msk [vmem:[#allocation2 + $0x20] sm:$0xff] %vm201_vm0, %v551_v7  ;;  %203 = vst.msk [vmem:[#allocation2 + $0x10] sm:$0xff] %vm201_vm0, %v550_v8  ;;  %291 = vrot.lane.b32.xlu0 %v565_v1, %s804_s18  ;;  %574 = vmatprep.mubr.msk.f32.mxu0 %vm303_vm1, %v320_v10  ;;  %s437_s3 = scalar_lea.sflag [#allocation5], %s932_s29  ;;  %s713_s4 = scalar_lea.vmem %s1012_s19, 128 }
  0x43   : > { %289 = vrot.lane.b32.xlu1 %v557_v0, %s804_s18  ;;  %202 = vst.msk [vmem:[#allocation2] sm:$0xff] %vm201_vm0, %v193_v9  ;;  %p714_p3 = scmp.ne.s32.totalorder %s1012_s19, %s713_s4  ;;  %p1072_p13 = scmp.ne.s32.totalorder %s1066_s21, 0 }
  0x44   : > { %s805_s12 = smov [#allocation8]  }
  0x45   : > { %p715_p4 = pnand %p714_p3, %p1072_p13  ;;  %s717_s6 = sshll.u32 %s805_s12, 4  ;;  %s718_s6 = int_to_ptr.vmem [resolvable:$false] %s717_s6 }
  0x46   : > { %237 = vrot.lane.b32.xlu0 %v555_v3, %s803_s20  ;;  %s719_s5 = scalar_lea.vmem %s718_s6, 256  ;;  %p720_p8 = scmp.lt.s32.totalorder %s1012_s19, %s718_s6 }
  0x47   : > { %287 = vrot.lane.b32.xlu1 %v556_v2, %s804_s18  ;;  %p716_p1 = pneg %p715_p4  ;;  %p721_p7 = scmp.lt.s32.totalorder %s719_s5, %s713_s4 }
  0x49   : > { %p722_p9 = por %p721_p7, %p720_p8 }
  0x4a   : > { %235 = vrot.lane.b32.xlu0 %v554_v4, %s803_s20 }
  0x4b   : > { %285 = vrot.lane.b32.xlu1 %v555_v3, %s804_s18  ;;  %p723_p12 = pnand %p722_p9, %p716_p1 }
  0x4e   : > { %233 = vrot.lane.b32.xlu0 %v553_v5, %s803_s20 }
  0x4f   : > { %283 = vrot.lane.b32.xlu1 %v554_v4, %s804_s18 }
  0x52   : > { %231 = vrot.lane.b32.xlu0 %v552_v6, %s803_s20 }
  0x53   : > { %281 = vrot.lane.b32.xlu1 %v553_v5, %s804_s18 }
  0x56   : > { %229 = vrot.lane.b32.xlu0 %v551_v7, %s803_s20 }
  0x57   : > { %279 = vrot.lane.b32.xlu1 %v552_v6, %s804_s18 }
  0x5a   : > { %227 = vrot.lane.b32.xlu0 %v550_v8, %s803_s20 }
  0x5b   : > { %277 = vrot.lane.b32.xlu1 %v551_v7, %s804_s18 }
  0xb0   : > { %v242_v11 = vpop.permute.xlu0 %241 }
  0xb1   : > { %v240_v12 = vpop.permute.xlu1 %239  ;;  %259 = vst.msk [vmem:[#allocation2 + $0x70] sm:$0xff] %vm251_vm2, %v242_v11 }
  0xb2   : > { %258 = vst.msk [vmem:[#allocation2 + $0x60] sm:$0xff] %vm251_vm2, %v240_v12 }
  0xb4   : > { %v292_v13 = vpop.permute.xlu0 %291 }
  0xb5   : > { %v290_v14 = vpop.permute.xlu1 %289  ;;  %317 = vst.msk [vmem:[#allocation2 + $0x70] sm:$0xff] %vm301_vm3, %v292_v13 }
  0xb6   : > { %318 = vst.msk [vmem:[#allocation2 + $0x78] sm:$0xff] %vm303_vm1, %v292_v13  ;;  %316 = vst.msk [vmem:[#allocation2 + $0x68] sm:$0xff] %vm303_vm1, %v290_v14 }
  0xb7   : > { %315 = vst.msk [vmem:[#allocation2 + $0x60] sm:$0xff] %vm301_vm3, %v290_v14 }
  0xb8   : > { %v238_v15 = vpop.permute.xlu0 %237 }
  0xb9   : > { %v288_v16 = vpop.permute.xlu1 %287  ;;  %257 = vst.msk [vmem:[#allocation2 + $0x50] sm:$0xff] %vm251_vm2, %v238_v15 }
  0xba   : > { %314 = vst.msk [vmem:[#allocation2 + $0x58] sm:$0xff] %vm303_vm1, %v288_v16 }
  0xbb   : > { %313 = vst.msk [vmem:[#allocation2 + $0x50] sm:$0xff] %vm301_vm3, %v288_v16 }
  0xbc   : > { %v335_v18 = vld [vmem:[#allocation2 + $0x70] sm:$0xff]  ;;  %v236_v19 = vpop.permute.xlu0 %235 }
  0xbd   : > { %v336_v17 = vld [vmem:[#allocation2 + $0x78] sm:$0xff]  ;;  %v286_v20 = vpop.permute.xlu1 %285  ;;  %v334_v21 = vld [vmem:[#allocation2 + $0x68] sm:$0xff]  ;;  %256 = vst.msk [vmem:[#allocation2 + $0x40] sm:$0xff] %vm251_vm2, %v236_v19 }
  0xbe   : > { %566 = vmatprep.subr.msk.mxu0 %vm303_vm1, %v336_v17  ;;  %312 = vst.msk [vmem:[#allocation2 + $0x48] sm:$0xff] %vm303_vm1, %v286_v20  ;;  %v333_v22 = vld [vmem:[#allocation2 + $0x60] sm:$0xff] }
  0xbf   : > { %381 = vmatpush1.xpose.msra.mxu0 %v335_v18  ;;  %311 = vst.msk [vmem:[#allocation2 + $0x40] sm:$0xff] %vm301_vm3, %v286_v20 }
  0xc0   : > { %567 = vmatprep.subr.msk.mxu0 %vm303_vm1, %v334_v21  ;;  %v234_v23 = vpop.permute.xlu0 %233 }
  0xc1   : > { %v284_v24 = vpop.permute.xlu1 %283  ;;  %v332_v25 = vld [vmem:[#allocation2 + $0x58] sm:$0xff]  ;;  %255 = vst.msk [vmem:[#allocation2 + $0x30] sm:$0xff] %vm251_vm2, %v234_v23 }
  0xc2   : > { %310 = vst.msk [vmem:[#allocation2 + $0x38] sm:$0xff] %vm303_vm1, %v284_v24  ;;  %v331_v26 = vld [vmem:[#allocation2 + $0x50] sm:$0xff] }
  0xc3   : > { %383 = vmatpush1.xpose.msra.mxu0 %v333_v22  ;;  %309 = vst.msk [vmem:[#allocation2 + $0x30] sm:$0xff] %vm301_vm3, %v284_v24 }
  0xc4   : > { %568 = vmatprep.subr.msk.mxu0 %vm303_vm1, %v332_v25  ;;  %v232_v27 = vpop.permute.xlu0 %231 }
  0xc5   : > { %v282_v28 = vpop.permute.xlu1 %281  ;;  %v330_v29 = vld [vmem:[#allocation2 + $0x48] sm:$0xff]  ;;  %254 = vst.msk [vmem:[#allocation2 + $0x20] sm:$0xff] %vm251_vm2, %v232_v27 }
  0xc6   : > { %308 = vst.msk [vmem:[#allocation2 + $0x28] sm:$0xff] %vm303_vm1, %v282_v28  ;;  %v329_v30 = vld [vmem:[#allocation2 + $0x40] sm:$0xff] }
  0xc7   : > { %385 = vmatpush1.xpose.msra.mxu0 %v331_v26  ;;  %307 = vst.msk [vmem:[#allocation2 + $0x20] sm:$0xff] %vm301_vm3, %v282_v28 }
  0xc8   : > { %569 = vmatprep.subr.msk.mxu0 %vm303_vm1, %v330_v29  ;;  %v230_v31 = vpop.permute.xlu0 %229 }
  0xc9   : > { %v280_v32 = vpop.permute.xlu1 %279  ;;  %v328_v33 = vld [vmem:[#allocation2 + $0x38] sm:$0xff]  ;;  %253 = vst.msk [vmem:[#allocation2 + $0x10] sm:$0xff] %vm251_vm2, %v230_v31 }
  0xca   : > { %306 = vst.msk [vmem:[#allocation2 + $0x18] sm:$0xff] %vm303_vm1, %v280_v32  ;;  %v327_v34 = vld [vmem:[#allocation2 + $0x30] sm:$0xff] }
  0xcb   : > { %387 = vmatpush1.xpose.msra.mxu0 %v329_v30  ;;  %305 = vst.msk [vmem:[#allocation2 + $0x10] sm:$0xff] %vm301_vm3, %v280_v32 }
  0xcc   : > { %570 = vmatprep.subr.msk.mxu0 %vm303_vm1, %v328_v33  ;;  %v228_v35 = vpop.permute.xlu0 %227 }
  0xcd   : > { %v278_v36 = vpop.permute.xlu1 %277  ;;  %v326_v37 = vld [vmem:[#allocation2 + $0x28] sm:$0xff]  ;;  %252 = vst.msk [vmem:[#allocation2] sm:$0xff] %vm251_vm2, %v228_v35 }
  0xce   : > { %304 = vst.msk [vmem:[#allocation2 + $0x8] sm:$0xff] %vm303_vm1, %v278_v36  ;;  %v325_v38 = vld [vmem:[#allocation2 + $0x20] sm:$0xff] }
  0xcf   : > { %389 = vmatpush1.xpose.msra.mxu0 %v327_v34  ;;  %302 = vst.msk [vmem:[#allocation2] sm:$0xff] %vm301_vm3, %v278_v36 }
  0xd0   : > { %571 = vmatprep.subr.msk.mxu0 %vm303_vm1, %v326_v37 }
  0xd1   : > { %v324_v39 = vld [vmem:[#allocation2 + $0x18] sm:$0xff] }
  0xd2   : > { %v323_v40 = vld [vmem:[#allocation2 + $0x10] sm:$0xff] }
  0xd3   : > { %391 = vmatpush1.xpose.msra.mxu0 %v325_v38 }
  0xd4   : > { %572 = vmatprep.subr.msk.mxu0 %vm303_vm1, %v324_v39 }
  0xd5   : > { %v322_v41 = vld [vmem:[#allocation2 + $0x8] sm:$0xff] }
  0xd6   : > { %v321_v42 = vld [vmem:[#allocation2] sm:$0xff] }
  0xd7   : > { %393 = vmatpush1.xpose.msra.mxu0 %v323_v40 }
  0xd8   : > { %573 = vmatprep.subr.msk.mxu0 %vm303_vm1, %v322_v41 }
  0xdb   : > { %395 = vmatpush1.xpose.msra.mxu0 %v321_v42 }
  0xde   : > { %429 = vmatmul.mubr.f32.vlgmr.msra.gmra.mxu0 %v319_v43 }
 0x19e   : > { %v430_v44 = vpop.f32.mrf.mxu0 }
 0x19f   : > { %435 = vst.msk [vmem:[%s191_s16] sm:$0xff] %vm434_vm4, %v430_v44 }
 0x1a0   : > { %v432_v45 = vpop.f32.mrf.mxu0 }
 0x1a1   : > { %726 = shalt.err (!%p723_p12)
}
 0x1a2   : > { %s727_s17 = scalar_lea.hbm %s1010_s25, 128  ;;  %s731_s8 = scalar_lea.hbm %s1060_s2, 256 }
 0x1a3   : > { %p728_p0 = scmp.ne.s32.totalorder %s1010_s25, %s727_s17  ;;  %p732_p10 = scmp.lt.s32.totalorder %s1010_s25, %s1060_s2 }
 0x1a4   : > { %p733_p11 = scmp.lt.s32.totalorder %s731_s8, %s727_s17 }
 0x1a5   : > { %p729_p2 = pnand %p728_p0, %p1072_p13 }
 0x1a6   : > { %p734_p5 = por %p733_p11, %p732_p10 }
 0x1a7   : > { %p730_p6 = pneg %p729_p2 }
 0x1a9   : > { %p735_p3 = pnand %p734_p5, %p730_p6 }
 0x1ab   : > { %738 = shalt.err (!%p735_p3)
}
 0x1ac   : > { %588 = dma.vmem_to_hbm [thread:$0]  (%p1072_p13), %s1012_s19, 128, %s1010_s25, %s437_s3  }
 0x1ad PF: > { %s463_s18 = sand.u32 1, %s777_s9   ;;  %p1073_p4 = scmp.ne.s32.totalorder %s1067_s22, 0 }
 0x1ae   : > { %p1074_p1 = scmp.ge.s32.totalorder %s797_s14, 2  ;;  %s464_s23 = scalar_lea.sflag [#allocation5], %s463_s18 }
 0x1b0   : > { %p599_p8 = pnand %p1074_p1, %p1073_p4 }
 0x1b2   : > { %p600_p7 = pneg %p599_p8 }
 0x1b4   : > { %772 = dma.done.wait (%p600_p7), %s464_s23, 128  }
 0x1b5   : > { %774 = vsyncadd (%p600_p7), %s464_s23, 4294967168  ;;  %s19_s14 = sadd.s32 1, %s797_s14   ;;  %s1075_s9 = smov %s781_s10 }
 0x1b6   : > { %p16_p9 = scmp.ge.s32.totalorder %s19_s14, 4   ;;  %s1076_s10 = smov %s785_s11 }
 0x1b7   : > { %s1077_s11 = smov %s923_s27  ;;  %s1078_s12 = smov %s793_s13 }
 0x1b8   : > { %s1079_s13 = smov %s1081_s28  ;;  %18 = sbr.rel (!%p16_p9) target bundleno = 7 (0x7), region = 79 }
 0x1bd   :  { %469 = vsyncpa [#allocation4], 1 }
 0x1be   :  { %471 = vsyncpa [#allocation4 + $0x1], 1 }
 0x1bf   :  { %472 = vsyncpa [#allocation7], 1 }
 0x1c0   :  { %473 = vsyncpa [#allocation5], 1 }
 0x1c1   :  { %475 = vsyncpa [#allocation5 + $0x1], 1 }

</bundles_post_ra>
